<compile_context>
chip_gen: v7x
topology: tpu7x:2x2x1
jax: 0.10.0
libtpu: 0.0.40
codegen_flags: <defaults>
</compile_context>

<pallas_src>
import functools

import jax
import jax.numpy as jnp
from jax import lax
from jax.experimental import pallas as pl
from jax.experimental.pallas import tpu as pltpu


# --------------------------------------------------------------------------- #
# Kernel bodies
# --------------------------------------------------------------------------- #
def _conv_head_body(xwin, w_ref, shift_ref, w1_ref, b1_ref, out_ref, *, width):
    """Shared compute on a flattened, padded pixel window.

    xwin     : (C, Lw)      bf16  window of the SAME-padded flattened image,
                                  Lw = TH*W + 2W + 2
    w_ref    : (3, C, 3C)   bf16  3x3 conv weight, BN scale folded in; for tap
                                  row kh the columns are ordered kw-major,
                                  ci-minor
    shift_ref: (C, 1)       f32   folded BN shift
    w1_ref   : (Co, C)      bf16  1x1 classifier weight(s), transposed
    b1_ref   : (Co, 1)      f32   classifier bias(es)
    out_ref  : (1, Co, TH*W)      NCHW output block, pixels flattened on lanes
    """
    W = width
    tw = out_ref.shape[2]                       # TH * W (lane-dense)
    lw = xwin.shape[1]                          # tw + 2W + 2

    # Hoisted kw edge masks (2 selects over the window instead of 6 per-tap):
    # window index i holds the pixel at column (i - 1) mod W, so i % W == 0
    # positions hold column W-1 pixels (only ever read invalidly by kw == 0
    # taps) and i % W == 1 positions hold column 0 pixels (only ever read
    # invalidly by kw == 2 taps).  Zeroing them reproduces SAME padding in W.
    col = jax.lax.broadcasted_iota(jnp.int32, (1, lw), 1) % W
    zero = jnp.zeros((), xwin.dtype)
    x_l = jnp.where(col == 0, zero, xwin)       # source slab for kw == 0 taps
    x_r = jnp.where(col == 1, zero, xwin)       # source slab for kw == 2 taps

    # 3x3 conv (+ folded BN scale) as 3 accumulating MXU matmuls (K = 3C each):
    # smaller peak VMEM temp than one (9C, tw) slab, same FLOPs.
    acc = jnp.zeros((w_ref.shape[1], tw), jnp.float32)
    for kh in range(3):
        s = kh * W
        slab = jnp.concatenate(
            [x_l[:, s:s + tw],                  # kw == 0
             xwin[:, s + 1:s + 1 + tw],         # kw == 1
             x_r[:, s + 2:s + 2 + tw]],         # kw == 2
            axis=0)                             # (3C, tw) bf16
        acc = acc + jnp.dot(w_ref[kh], slab, preferred_element_type=jnp.float32)

    # BN shift + ReLU, then the fused 1x1 classifier matmul.
    y = jnp.maximum(acc + shift_ref[...], 0.0)                        # (C, tw)
    out = jnp.dot(w1_ref[...], y.astype(jnp.bfloat16),
                  preferred_element_type=jnp.float32) + b1_ref[...]   # (Co, tw)
    out_ref[...] = out[None].astype(out_ref.dtype)


def _tdhead_kernel_full(x_ref, w_ref, shift_ref, w1_ref, b1_ref, out_ref, *, width):
    """Whole (padded, flattened) image per grid step: x_ref is the window."""
    _conv_head_body(x_ref[0], w_ref, shift_ref, w1_ref, b1_ref, out_ref,
                    width=width)


def _tdhead_kernel_tiled(x_ref, halo_ref, w_ref, shift_ref, w1_ref, b1_ref,
                         out_ref, *, width):
    """Row-blocked: non-overlapping body block + small (2W+2)-lane halo."""
    xwin = jnp.concatenate([x_ref[0], halo_ref[0, 0]], axis=1)
    _conv_head_body(xwin, w_ref, shift_ref, w1_ref, b1_ref, out_ref,
                    width=width)


# --------------------------------------------------------------------------- #
# Tile selection (VMEM-budget aware)
# --------------------------------------------------------------------------- #
def _vmem_capacity_bytes():
    try:
        info = pltpu.get_tpu_info()
        cap = int(getattr(info, "vmem_capacity_bytes", 0) or 0)
        if cap > 0:
            return cap
    except Exception:
        pass
    return 64 * 1024 * 1024   # conservative: v7x per-core VMEM


def _footprint_bytes(C, H, W, Co, th):
    """Rough per-grid-step VMEM footprint for row-block height `th`."""
    tw = th * W
    lw = tw + 2 * W + 2
    inp = 2 * 2 * C * lw * 2                       # body+halo, double buffered
    wts = 2 * 2 * (9 * C * C + Co * C) + 4 * (C + Co)
    outp = 2 * Co * tw * 4                         # double-buffered output
    temps = (3 * C * lw * 2                        # window + 2 masked copies
             + 3 * C * tw * 2                      # per-kh im2col slab (bf16)
             + C * tw * 4 + C * tw * 2             # f32 acc + bf16 relu copy
             + Co * tw * 4)                        # classifier result
    return inp + wts + outp + temps


def _pick_block_rows(C, H, W, Co, budget):
    """Prefer the whole image per grid step (min per-step overhead); otherwise
    the largest divisor TH of H with TH*W % 128 == 0 that fits the budget."""
    if _footprint_bytes(C, H, W, Co, H) <= budget:
        return H
    cands = [th for th in range(H - 1, 0, -1)
             if H % th == 0 and (th * W) % 128 == 0]
    for th in cands:
        if _footprint_bytes(C, H, W, Co, th) <= budget:
            return th
    return cands[-1] if cands else H   # best effort


# --------------------------------------------------------------------------- #
# Wrapper
# --------------------------------------------------------------------------- #
def _run_tdhead(x_nchw, params, cls_w_t, cls_b, *, block_rows=None,
                out_dtype=jnp.float32):
    """conv_layer (3x3 conv + BN + ReLU) followed by a 1x1 classifier matmul
    with weights `cls_w_t` (Co, C) and bias `cls_b` (Co, 1)."""
    N, C, H, W = x_nchw.shape
    Co = cls_w_t.shape[0]
    eps = 1e-5

    # Fold BN scale into the conv weight (output-channel axis), shift -> bias.
    scale = params["bn_gamma"] * lax.rsqrt(params["bn_var"] + eps)
    shift = params["bn_beta"] - params["bn_mean"] * scale
    w3 = params["conv_w"] * scale[None, None, None, :]        # (kh,kw,ci,co) HWIO
    w_mat = jnp.transpose(w3, (0, 3, 1, 2)).reshape(3, C, 3 * C).astype(jnp.bfloat16)
    shift_col = shift.reshape(C, 1).astype(jnp.float32)
    w1t = cls_w_t.astype(jnp.bfloat16)
    b1 = cls_b.astype(jnp.float32)

    halo_w = 2 * W + 2
    lfull = H * W + halo_w

    cap = _vmem_capacity_bytes()
    th = block_rows if block_rows is not None else _pick_block_rows(
        C, H, W, Co, int(cap * 0.6))
    assert H % th == 0, "block_rows must divide H"
    n_rb = H // th
    tw = th * W
    if n_rb > 1 and tw % 128 != 0:
        raise ValueError("row-blocked path needs block_rows*W % 128 == 0")

    # Single fused pad + bf16 cast: flatten pixels onto lanes and pad W+1 zero
    # lanes each side (== SAME row padding + 1 lane of slack for the kw shifts).
    xflat = jnp.pad(x_nchw.reshape(N, C, H * W).astype(jnp.bfloat16),
                    ((0, 0), (0, 0), (W + 1, W + 1)))          # (N, C, lfull)

    vmem_limit = int(min(cap * 0.9,
                         max(32 * 1024 * 1024,
                             (_footprint_bytes(C, H, W, Co, th) * 5) // 4)))
    cparams = pltpu.CompilerParams(
        dimension_semantics=("parallel", "parallel"),
        vmem_limit_bytes=vmem_limit)

    const_specs = [
        pl.BlockSpec((3, C, 3 * C), lambda n, j: (0, 0, 0)),
        pl.BlockSpec((C, 1), lambda n, j: (0, 0)),
        pl.BlockSpec((Co, C), lambda n, j: (0, 0)),
        pl.BlockSpec((Co, 1), lambda n, j: (0, 0)),
    ]
    out_spec = pl.BlockSpec((1, Co, tw), lambda n, j: (n, 0, j))
    out_shape = jax.ShapeDtypeStruct((N, Co, H * W), out_dtype)

    if n_rb == 1:
        kernel = functools.partial(_tdhead_kernel_full, width=W)
        in_specs = [pl.BlockSpec((1, C, lfull), lambda n, j: (n, 0, 0))] + const_specs
        args = (xflat, w_mat, shift_col, w1t, b1)
    else:
        # Tiny per-block halo (2 rows + 2 slack lanes); body blocks stay
        # non-overlapping so the input is DMA'd exactly once.
        halo = jnp.stack(
            [lax.slice_in_dim(xflat, (j + 1) * tw, (j + 1) * tw + halo_w, axis=2)
             for j in range(n_rb)],
            axis=1)                                            # (N, n_rb, C, halo_w)
        kernel = functools.partial(_tdhead_kernel_tiled, width=W)
        in_specs = [pl.BlockSpec((1, C, tw), lambda n, j: (n, 0, j)),
                    pl.BlockSpec((1, 1, C, halo_w), lambda n, j: (n, j, 0, 0))
                    ] + const_specs
        args = (xflat, halo, w_mat, shift_col, w1t, b1)

    out_flat = pl.pallas_call(
        kernel,
        out_shape=out_shape,
        grid_spec=pltpu.PrefetchScalarGridSpec(
            num_scalar_prefetch=0,
            grid=(N, n_rb),
            in_specs=in_specs,
            out_specs=out_spec),
        compiler_params=cparams,
    )(*args)

    # (N, Co, H*W) -> (N, Co, H, W): contiguous reshape, no transpose.
    return out_flat.reshape(N, Co, H, W)


def tdhead_forward(x_nchw, params, o: int, **kw):
    """Module-faithful forward(x, o): conv_layer then classifier[o]."""
    w1t = params["cls_w"][o].T
    b1 = params["cls_b"][o].reshape(-1, 1)
    return _run_tdhead(x_nchw, params, w1t, b1, **kw)


def tdhead_forward_all(x_nchw, params, **kw):
    """All classifier heads fused into ONE pallas_call (conv amortized once);
    returns a list of per-head outputs (parts heads + object head)."""
    w1t = jnp.concatenate([w.T for w in params["cls_w"]], axis=0)
    b1 = jnp.concatenate(params["cls_b"], axis=0).reshape(-1, 1)
    out = _run_tdhead(x_nchw, params, w1t, b1, **kw)
    outs, start = [], 0
    for w in params["cls_w"]:
        co = w.shape[1]
        outs.append(out[:, start:start + co])
        start += co
    return outs


# --------------------------------------------------------------------------- #
# Reference & test harness
# --------------------------------------------------------------------------- #
def tdhead_reference(x_nchw, params, o: int):
    """Pure-JAX reference (NCHW conv) for correctness checking."""
    eps = 1e-5
    y = lax.conv_general_dilated(
        x_nchw, params["conv_w"], window_strides=(1, 1), padding="SAME",
        dimension_numbers=("NCHW", "HWIO", "NCHW"),
    )
    scale = params["bn_gamma"] / jnp.sqrt(params["bn_var"] + eps)
    shift = params["bn_beta"] - params["bn_mean"] * scale
    y = jnp.maximum(y * scale.reshape(1, -1, 1, 1) + shift.reshape(1, -1, 1, 1), 0.0)
    out = jnp.einsum("nchw,co->nohw", y, params["cls_w"][o])
    out = out + params["cls_b"][o].reshape(1, -1, 1, 1)
    return out


def make_params(key, in_channels, n_objects, parts_sections):
    """Deterministic synthetic parameters matching TDHead.__init__ shapes."""
    C = in_channels
    head_channels = list(parts_sections) + [n_objects]
    keys = jax.random.split(key, 3 + 2 * len(head_channels))

    params = {
        # conv_layer: Conv2d(C, C, ks=3, pad=1, bias=False) + BatchNorm2d + ReLU
        "conv_w": jax.random.normal(keys[0], (3, 3, C, C), jnp.float32) * 0.1,
        "bn_gamma": 1.0 + 0.1 * jax.random.normal(keys[1], (C,), jnp.float32),
        "bn_beta": 0.1 * jax.random.normal(keys[2], (C,), jnp.float32),
        "bn_mean": jnp.zeros((C,), jnp.float32),
        "bn_var": jnp.ones((C,), jnp.float32),
        # classifier ModuleList: 1x1 convs with bias, out-channels per head
        "cls_w": [
            jax.random.normal(keys[3 + 2 * i], (C, co), jnp.float32) * 0.1
            for i, co in enumerate(head_channels)
        ],
        "cls_b": [
            0.1 * jax.random.normal(keys[4 + 2 * i], (co,), jnp.float32)
            for i, co in enumerate(head_channels)
        ],
    }
    return params


if __name__ == "__main__":
    key = jax.random.PRNGKey(0)
    k_param, k_x = jax.random.split(key)

    in_channels = 8
    n_objects = 5
    parts_sections = [4, 6]
    N, H, W = 2, 16, 16

    params = make_params(k_param, in_channels, n_objects, parts_sections)
    x = jax.random.normal(k_x, (N, in_channels, H, W), jnp.float32)

    tol = dict(atol=5e-2, rtol=5e-2)   # bf16 MXU operands, f32 accumulation
    ok = True

    # Fused path: every classifier head from a single pallas_call.
    outs = jax.block_until_ready(tdhead_forward_all(x, params))
    for o, out in enumerate(outs):
        if not jnp.allclose(out, tdhead_reference(x, params, o), **tol):
            ok = False

    # Module-faithful single-head path, also exercising the row-blocked grid.
    out1 = jax.block_until_ready(tdhead_forward(x, params, 1, block_rows=8))
    if not jnp.allclose(out1, tdhead_reference(x, params, 1), **tol):
        ok = False

    print("KERNEL_OK" if ok else "KERNEL_MISMATCH")
</pallas_src>

<mosaic_0001>
module attributes {stable_mosaic.version = 11 : i64} {
  func.func @_tdhead_kernel_full(%arg0: i32, %arg1: i32, %arg2: memref<1x8x290xbf16, #tpu.memory_space<vmem>>, %arg3: memref<3x8x24xbf16, #tpu.memory_space<vmem>>, %arg4: memref<8x1xf32, #tpu.memory_space<vmem>>, %arg5: memref<15x8xbf16, #tpu.memory_space<vmem>>, %arg6: memref<15x1xf32, #tpu.memory_space<vmem>>, %arg7: memref<1x15x256xf32, #tpu.memory_space<vmem>>) attributes {dimension_semantics = [#tpu.dimension_semantics<parallel>, #tpu.dimension_semantics<parallel>], iteration_bounds = array<i64: 2, 1>, scalar_prefetch = 0 : i64, scratch_operands = 0 : i64, tpu.core_type = #tpu.core_type<tc>, window_params = [{transform_indices = @transform_0, window_bounds = array<i64: 1, 8, 290>}, {pipeline_mode = #tpu.pipeline_mode<synchronous>, transform_indices = @transform_1, window_bounds = array<i64: 3, 8, 24>}, {pipeline_mode = #tpu.pipeline_mode<synchronous>, transform_indices = @transform_2, window_bounds = array<i64: 8, 1>}, {pipeline_mode = #tpu.pipeline_mode<synchronous>, transform_indices = @transform_3, window_bounds = array<i64: 15, 8>}, {pipeline_mode = #tpu.pipeline_mode<synchronous>, transform_indices = @transform_4, window_bounds = array<i64: 15, 1>}, {transform_indices = @transform_5, window_bounds = array<i64: 1, 15, 256>}]} {
    %c0 = arith.constant 0 : index
    %c0_0 = arith.constant 0 : index
    %c0_1 = arith.constant 0 : index
    %0 = vector.load %arg2[%c0, %c0_0, %c0_1] : memref<1x8x290xbf16, #tpu.memory_space<vmem>>, vector<1x8x290xbf16>
    %1 = vector.shape_cast %0 : vector<1x8x290xbf16> to vector<8x290xbf16>
    %2 = tpu.iota {dimensions = array<i32: 1>} : vector<1x290xi32>
    %c16_i32 = arith.constant 16 : i32
    %c0_i32 = arith.constant 0 : i32
    %3 = arith.cmpi eq, %c16_i32, %c0_i32 : i32
    %c1_i32 = arith.constant 1 : i32
    %4 = arith.select %3, %c1_i32, %c16_i32 : i32
    %5 = vector.broadcast %4 : i32 to vector<1x290xi32>
    %6 = arith.remsi %2, %5 : vector<1x290xi32>
    %c0_i32_2 = arith.constant 0 : i32
    %7 = vector.broadcast %c0_i32_2 : i32 to vector<1x290xi32>
    %8 = arith.cmpi ne, %6, %7 : vector<1x290xi32>
    %c0_i32_3 = arith.constant 0 : i32
    %9 = vector.broadcast %c0_i32_3 : i32 to vector<1x290xi32>
    %10 = arith.cmpi slt, %6, %9 : vector<1x290xi32>
    %c0_i32_4 = arith.constant 0 : i32
    %11 = arith.cmpi slt, %4, %c0_i32_4 : i32
    %12 = vector.broadcast %11 : i1 to vector<1x290xi1>
    %13 = vector.broadcast %12 : vector<1x290xi1> to vector<1x290xi1>
    %14 = arith.xori %10, %13 : vector<1x290xi1>
    %15 = arith.andi %14, %8 : vector<1x290xi1>
    %16 = vector.broadcast %4 : i32 to vector<1x290xi32>
    %17 = arith.addi %6, %16 : vector<1x290xi32>
    %18 = arith.select %15, %17, %6 : vector<1x290xi1>, vector<1x290xi32>
    %c0_i32_5 = arith.constant 0 : i32
    %19 = vector.broadcast %c0_i32_5 : i32 to vector<1x290xi32>
    %20 = arith.cmpi eq, %18, %19 : vector<1x290xi32>
    %cst = arith.constant 0.000000e+00 : bf16
    %21 = vector.shape_cast %20 : vector<1x290xi1> to vector<1x290xi1>
    %22 = vector.broadcast %21 : vector<1x290xi1> to vector<8x290xi1>
    %23 = vector.broadcast %cst : bf16 to vector<8x290xbf16>
    %24 = arith.select %22, %23, %1 : vector<8x290xi1>, vector<8x290xbf16>
    %c1_i32_6 = arith.constant 1 : i32
    %25 = vector.broadcast %c1_i32_6 : i32 to vector<1x290xi32>
    %26 = arith.cmpi eq, %18, %25 : vector<1x290xi32>
    %cst_7 = arith.constant 0.000000e+00 : bf16
    %27 = vector.shape_cast %26 : vector<1x290xi1> to vector<1x290xi1>
    %28 = vector.broadcast %27 : vector<1x290xi1> to vector<8x290xi1>
    %29 = vector.broadcast %cst_7 : bf16 to vector<8x290xbf16>
    %30 = arith.select %28, %29, %1 : vector<8x290xi1>, vector<8x290xbf16>
    %cst_8 = arith.constant 0.000000e+00 : f32
    %31 = vector.broadcast %cst_8 : f32 to vector<8x256xf32>
    %32 = vector.extract_strided_slice %24 {offsets = [0, 0], sizes = [8, 256], strides = [1, 1]} : vector<8x290xbf16> to vector<8x256xbf16>
    %33 = vector.extract_strided_slice %1 {offsets = [0, 1], sizes = [8, 256], strides = [1, 1]} : vector<8x290xbf16> to vector<8x256xbf16>
    %34 = vector.extract_strided_slice %30 {offsets = [0, 2], sizes = [8, 256], strides = [1, 1]} : vector<8x290xbf16> to vector<8x256xbf16>
    %35 = tpu.concatenate %32, %33, %34 in 0 : vector<8x256xbf16>, vector<8x256xbf16>, vector<8x256xbf16> -> vector<24x256xbf16>
    %c0_9 = arith.constant 0 : index
    %c0_10 = arith.constant 0 : index
    %c0_11 = arith.constant 0 : index
    %36 = vector.load %arg3[%c0_9, %c0_10, %c0_11] : memref<3x8x24xbf16, #tpu.memory_space<vmem>>, vector<1x8x24xbf16>
    %37 = vector.shape_cast %36 : vector<1x8x24xbf16> to vector<8x24xbf16>
    %cst_12 = arith.constant dense<0.000000e+00> : vector<8x256xf32>
    %38 = tpu.matmul %37, %35, %cst_12 {dimension_numbers = #tpu.dot_dimension_numbers<[1], [0], [0], [1], [0, 0, 1, 1], [], []>} : vector<8x24xbf16>, vector<24x256xbf16>, vector<8x256xf32> -> vector<8x256xf32>
    %39 = arith.addf %31, %38 : vector<8x256xf32>
    %40 = vector.extract_strided_slice %24 {offsets = [0, 16], sizes = [8, 256], strides = [1, 1]} : vector<8x290xbf16> to vector<8x256xbf16>
    %41 = vector.extract_strided_slice %1 {offsets = [0, 17], sizes = [8, 256], strides = [1, 1]} : vector<8x290xbf16> to vector<8x256xbf16>
    %42 = vector.extract_strided_slice %30 {offsets = [0, 18], sizes = [8, 256], strides = [1, 1]} : vector<8x290xbf16> to vector<8x256xbf16>
    %43 = tpu.concatenate %40, %41, %42 in 0 : vector<8x256xbf16>, vector<8x256xbf16>, vector<8x256xbf16> -> vector<24x256xbf16>
    %c1 = arith.constant 1 : index
    %c0_13 = arith.constant 0 : index
    %c0_14 = arith.constant 0 : index
    %44 = vector.load %arg3[%c1, %c0_13, %c0_14] : memref<3x8x24xbf16, #tpu.memory_space<vmem>>, vector<1x8x24xbf16>
    %45 = vector.shape_cast %44 : vector<1x8x24xbf16> to vector<8x24xbf16>
    %cst_15 = arith.constant dense<0.000000e+00> : vector<8x256xf32>
    %46 = tpu.matmul %45, %43, %cst_15 {dimension_numbers = #tpu.dot_dimension_numbers<[1], [0], [0], [1], [0, 0, 1, 1], [], []>} : vector<8x24xbf16>, vector<24x256xbf16>, vector<8x256xf32> -> vector<8x256xf32>
    %47 = arith.addf %39, %46 : vector<8x256xf32>
    %48 = vector.extract_strided_slice %24 {offsets = [0, 32], sizes = [8, 256], strides = [1, 1]} : vector<8x290xbf16> to vector<8x256xbf16>
    %49 = vector.extract_strided_slice %1 {offsets = [0, 33], sizes = [8, 256], strides = [1, 1]} : vector<8x290xbf16> to vector<8x256xbf16>
    %50 = vector.extract_strided_slice %30 {offsets = [0, 34], sizes = [8, 256], strides = [1, 1]} : vector<8x290xbf16> to vector<8x256xbf16>
    %51 = tpu.concatenate %48, %49, %50 in 0 : vector<8x256xbf16>, vector<8x256xbf16>, vector<8x256xbf16> -> vector<24x256xbf16>
    %c2 = arith.constant 2 : index
    %c0_16 = arith.constant 0 : index
    %c0_17 = arith.constant 0 : index
    %52 = vector.load %arg3[%c2, %c0_16, %c0_17] : memref<3x8x24xbf16, #tpu.memory_space<vmem>>, vector<1x8x24xbf16>
    %53 = vector.shape_cast %52 : vector<1x8x24xbf16> to vector<8x24xbf16>
    %cst_18 = arith.constant dense<0.000000e+00> : vector<8x256xf32>
    %54 = tpu.matmul %53, %51, %cst_18 {dimension_numbers = #tpu.dot_dimension_numbers<[1], [0], [0], [1], [0, 0, 1, 1], [], []>} : vector<8x24xbf16>, vector<24x256xbf16>, vector<8x256xf32> -> vector<8x256xf32>
    %55 = arith.addf %47, %54 : vector<8x256xf32>
    %c0_19 = arith.constant 0 : index
    %c0_20 = arith.constant 0 : index
    %56 = vector.load %arg4[%c0_19, %c0_20] : memref<8x1xf32, #tpu.memory_space<vmem>>, vector<8x1xf32>
    %57 = vector.broadcast %56 : vector<8x1xf32> to vector<8x256xf32>
    %58 = arith.addf %55, %57 : vector<8x256xf32>
    %cst_21 = arith.constant 0.000000e+00 : f32
    %59 = vector.broadcast %cst_21 : f32 to vector<8x256xf32>
    %60 = arith.maximumf %58, %59 : vector<8x256xf32>
    %c0_22 = arith.constant 0 : index
    %c0_23 = arith.constant 0 : index
    %61 = vector.load %arg5[%c0_22, %c0_23] : memref<15x8xbf16, #tpu.memory_space<vmem>>, vector<15x8xbf16>
    %62 = arith.truncf %60 : vector<8x256xf32> to vector<8x256xbf16>
    %cst_24 = arith.constant dense<0.000000e+00> : vector<15x256xf32>
    %63 = tpu.matmul %61, %62, %cst_24 {dimension_numbers = #tpu.dot_dimension_numbers<[1], [0], [0], [1], [0, 0, 1, 1], [], []>} : vector<15x8xbf16>, vector<8x256xbf16>, vector<15x256xf32> -> vector<15x256xf32>
    %c0_25 = arith.constant 0 : index
    %c0_26 = arith.constant 0 : index
    %64 = vector.load %arg6[%c0_25, %c0_26] : memref<15x1xf32, #tpu.memory_space<vmem>>, vector<15x1xf32>
    %65 = vector.broadcast %64 : vector<15x1xf32> to vector<15x256xf32>
    %66 = arith.addf %63, %65 : vector<15x256xf32>
    %67 = vector.shape_cast %66 : vector<15x256xf32> to vector<1x15x256xf32>
    %c0_27 = arith.constant 0 : index
    %c0_28 = arith.constant 0 : index
    %c0_29 = arith.constant 0 : index
    %68 = vector.load %arg7[%c0_27, %c0_28, %c0_29] : memref<1x15x256xf32, #tpu.memory_space<vmem>>, vector<1x15x256xf32>
    tpu.vector_store %arg7[%c0_27, %c0_28, %c0_29], %67 {strides = array<i32>} : memref<1x15x256xf32, #tpu.memory_space<vmem>>, vector<1x15x256xf32>,
    return
  }
  func.func @transform_0(%arg0: i32, %arg1: i32) -> (i32, i32, i32) {
    %c0_i32 = arith.constant 0 : i32
    %c0_i32_0 = arith.constant 0 : i32
    %c0_i32_1 = arith.constant 0 : i32
    return %arg0, %c0_i32, %c0_i32_0 : i32, i32, i32
  }
  func.func @transform_1(%arg0: i32, %arg1: i32) -> (i32, i32, i32) {
    %c0_i32 = arith.constant 0 : i32
    %c0_i32_0 = arith.constant 0 : i32
    %c0_i32_1 = arith.constant 0 : i32
    %c0_i32_2 = arith.constant 0 : i32
    return %c0_i32, %c0_i32_0, %c0_i32_1 : i32, i32, i32
  }
  func.func @transform_2(%arg0: i32, %arg1: i32) -> (i32, i32) {
    %c0_i32 = arith.constant 0 : i32
    %c0_i32_0 = arith.constant 0 : i32
    %c0_i32_1 = arith.constant 0 : i32
    return %c0_i32, %c0_i32_0 : i32, i32
  }
  func.func @transform_3(%arg0: i32, %arg1: i32) -> (i32, i32) {
    %c0_i32 = arith.constant 0 : i32
    %c0_i32_0 = arith.constant 0 : i32
    %c0_i32_1 = arith.constant 0 : i32
    return %c0_i32, %c0_i32_0 : i32, i32
  }
  func.func @transform_4(%arg0: i32, %arg1: i32) -> (i32, i32) {
    %c0_i32 = arith.constant 0 : i32
    %c0_i32_0 = arith.constant 0 : i32
    %c0_i32_1 = arith.constant 0 : i32
    return %c0_i32, %c0_i32_0 : i32, i32
  }
  func.func @transform_5(%arg0: i32, %arg1: i32) -> (i32, i32, i32) {
    %c0_i32 = arith.constant 0 : i32
    %c0_i32_0 = arith.constant 0 : i32
    return %arg0, %c0_i32, %arg1 : i32, i32, i32
  }
}

</mosaic_0001>

<bundles_post_ra>
// kernel: tpu_custom_call.1
= control target key start
LH: loop header
LB: loop body
LE: loop exit
PB: predicated region body
PF: predicated region fallthrough
CT: control target
= control target key end

     0   :  { %s865_s18 = smov 0   ;;  %s867_s19 = smov 0   ;;  %s947_s0 = inlined_call_operand.vmem [shape: bf16[2,8,290], index: 0, kind: input, shape index: {}]   ;;  %s948_s1 = inlined_call_operand.vmem [shape: bf16[3,8,24], index: 1, kind: input, shape index: {}]   ;;  %s949_s2 = inlined_call_operand.vmem [shape: f32[8,1], index: 2, kind: input, shape index: {}]   ;;  %s950_s3 = inlined_call_operand.vmem [shape: bf16[15,8], index: 3, kind: input, shape index: {}]   ;;  %s951_s4 = inlined_call_operand.vmem [shape: f32[15,1], index: 4, kind: input, shape index: {}]   ;;  %s952_s5 = inlined_call_operand.vmem [shape: f32[2,15,256], index: 5, kind: output, shape index: {}]  }
   0x1   :  { %s869_s20 = smov 0  }
   0x2 LB: > { %s27_s21 = sadd.s32 1, %s824_s19  ;;  %p743_p0 = scmp.ge.s32.totalorder %s828_s20, 1  ;;  %s828_s20 = sphi %s869_s20, %s15_s20   ;;  %s824_s19 = sphi %s867_s19, %s956_s19   ;;  %s820_s18 = sphi %s865_s18, %s955_s18  }
   0x3   : > { %p29_p1 = scmp.ge.s32.totalorder %s27_s21, 2  ;;  %p201_p2 = scmp.lt.s32.totalorder %s828_s20, 3 }
   0x5   : > { %s958_s21 = smov (%p29_p1, %s27_s21), 0  ;;  %p202_p3 = pnand %p743_p0, %p201_p2 }
   0x6   : > { %p233_p4 = scmp.lt.s32.totalorder (!%p202_p3), %s820_s18, 1  ;;  %v251_v0 = vlaneseq (!%p202_p3)  ;;  %s830_s26 = smov (!%p202_p3), 127   ;;  %vm336_vm10 = vcmask (!%p202_p3), 1039360   ;;  %vm356_vm11 = vcmask (!%p202_p3), 1043456   ;;  %vm353_vm12 = vcmask (!%p202_p3), 1031168   ;;  %v570_v39 = vld [vmem:[%s949_s2] sm:$0xff] (!%p202_p3) }
   0x7   : > { %205 = sbr.rel (%p202_p3) target bundleno = 725 (0x2d5), region = 40  ;;  %s831_s27 = smov (!%p202_p3), 126   ;;  %v834_v37 = vmov (!%p202_p3), 0   ;;  %vm396_vm13 = vcmask (!%p202_p3), 195584   ;;  %v365_v38 = vld [vmem:[%s948_s1] sm:$0xf] (!%p202_p3) }
   0x8   : > { %v252_v1 = vand.u32 (!%p202_p3), 127, %v251_v0  ;;  %s832_s28 = smov (!%p202_p3), 112   ;;  %s833_s29 = smov (!%p202_p3), 96   ;;  %438 = vmatprep.mubr.bf16.mxu0 (!%p202_p3), %v834_v37  ;;  %488 = vmatprep.mubr.bf16.mxu1 (!%p202_p3), %v834_v37  ;;  %vm389_vm14 = vcmask (!%p202_p3), 916480   ;;  %vm511_vm15 = vcmask (!%p202_p3), 785408  }
   0x9   : > { %800 = vset.pattern.permute.xlu0 (!%p202_p3), %v834_v37  ;;  %801 = vset.pattern.permute.xlu1 (!%p202_p3), %v834_v37  ;;  %v756_v55 = vld [vmem:[%s948_s1 + $0x4] sm:$0xf] (!%p202_p3)  ;;  %v761_v63 = vld [vmem:[%s948_s1 + $0x8] sm:$0xf] (!%p202_p3) }
   0xa   : > { %v253_v2 = vadd.s32 (!%p202_p3), 128, %v252_v1  ;;  %v259_v3 = vand.u32 (!%p202_p3), 15, %v252_v1  ;;  %v254_v4 = vadd.s32 (!%p202_p3), 256, %v252_v1 }
   0xc   : > { %v266_v5 = vand.u32 (!%p202_p3), 15, %v253_v2  ;;  %vm889_vm0 = vcmp.eq.s32.totalorder (!%p202_p3), %v259_v3, 1  ;;  %v273_v7 = vand.u32 (!%p202_p3), 15, %v254_v4  ;;  %vm291_vm5 = vcmp.eq.s32.totalorder (!%p202_p3), %v259_v3, 0  ;;  %v584_v4 = vld [vmem:[%s951_s4] sm:$0xff] (!%p202_p3) }
   0xe   : > { %s960_s18 = smov (!%p233_p4, %s820_s18), 1  ;;  %vm305_vm1 = vcmp.eq.s32.totalorder %v266_v5, 1  ;;  %vm306_vm3 = vcmp.eq.s32.totalorder %v273_v7, 1  ;;  %vm293_vm4 = vcmp.eq.s32.totalorder %v273_v7, 0  ;;  %vm292_vm6 = vcmp.eq.s32.totalorder %v266_v5, 0 }
   0xf   : > { %s770_s22 = smul.u32 12, %s960_s18  ;;  %vm313_vm2 = vmpackc.low %vm305_vm1, %vm889_vm0  ;;  %v585_v5 = vld [vmem:[%s951_s4 + $0x8] sm:$0x7f]  ;;  %vm601_vm0 = vcmask 64512   ;;  %s769_s23 = sshll.u32 %s960_s18, 5 }
  0x10   : > { %vm314_vm7 = vmpackc.low %vm306_vm3, %vm306_vm3 }
  0x11   : > { %s237_s25 = scalar_lea.vmem %s947_s0, %s770_s22  ;;  %vm301_vm8 = vmpackc.low %vm293_vm4, %vm293_vm4 }
  0x12   : > { %v249_v8 = vld [vmem:[%s237_s25] sm:$0xff]  ;;  %v250_v9 = vld [vmem:[%s237_s25 + $0x8] sm:$0xf]  ;;  %vm300_vm9 = vmpackc.low %vm292_vm6, %vm291_vm5 }
  0x13   : > { %v750_v10 = vcombine.high %v249_v8, %v249_v8  ;;  %v749_v11 = vcombine.low %v249_v8, %v249_v8  ;;  %v751_v12 = vcombine.low %v250_v9, %v250_v9  ;;  %v315_v13 = vsel %vm313_vm2, 0, %v249_v8 }
  0x14   : > { %v752_v14 = vcombine.low %v315_v13, %v315_v13  ;;  %v316_v15 = vsel %vm314_vm7, 0, %v250_v9  ;;  %v303_v16 = vsel %vm301_vm8, 0, %v250_v9  ;;  %v302_v17 = vsel %vm300_vm9, 0, %v249_v8 }
  0x15   : > { %332 = vrot.lane.b32.xlu0 %v750_v10, %s830_s26  ;;  %330 = vrot.lane.b32.xlu1 %v749_v11, %s830_s26  ;;  %v753_v18 = vcombine.high %v315_v13, %v315_v13  ;;  %v754_v19 = vcombine.low %v316_v15, %v316_v15  ;;  %v755_v22 = vcombine.low %v303_v16, %v303_v16 }
  0x16   : > { %v748_v23 = vcombine.high %v302_v17, %v302_v17  ;;  %v747_v24 = vcombine.low %v302_v17, %v302_v17 }
  0x19   : > { %334 = vrot.lane.b32.xlu0 %v751_v12, %s830_s26  ;;  %347 = vrot.lane.b32.xlu1 %v752_v14, %s831_s27  ;;  %s246_s26 = scalar_lea.vmem %s952_s5, %s769_s23 }
  0x1d   : > { %349 = vrot.lane.b32.xlu0 %v753_v18, %s831_s27  ;;  %351 = vrot.lane.b32.xlu1 %v754_v19, %s831_s27 }
  0x87   : > { %v333_v20 = vpop.permute.xlu0 %332  ;;  %v331_v21 = vpop.permute.xlu1 %330 }
  0x88   : > { %v337_v25 = vsel %vm336_vm10, %v331_v21, %v333_v20 }
  0x89   : > { %v359_v31 = vsel %vm356_vm11, %v747_v24, %v337_v25 }
  0x8b   : > { %v335_v26 = vpop.permute.xlu0 %334  ;;  %v348_v27 = vpop.permute.xlu1 %347 }
  0x8c   : > { %v338_v28 = vsel %vm336_vm10, %v333_v20, %v335_v26  ;;  %v371_v29 = vsel %vm356_vm11, %v755_v22, %v335_v26  ;;  %v805_v26 = vld [vmem:[%s950_s3] sm:$0xff]  }
  0x8d   : > { %381 = vrot.lane.b32.xlu1 %v371_v29, %s832_s28  ;;  %v363_v30 = vsel %vm356_vm11, %v748_v23, %v338_v28 }
  0x8e   : > { %379 = vrot.lane.b32.xlu0 %v363_v30, %s832_s28  ;;  %456 = vmatprep.subr.bf16.mxu1 %v363_v30 }
  0x8f   : > { %457 = vmatpush1.bf16.msra.mxu1 %v359_v31  ;;  %v350_v32 = vpop.permute.xlu0 %349  ;;  %v352_v33 = vpop.permute.xlu1 %351 }
  0x90   : > { %v354_v34 = vsel %vm353_vm12, %v348_v27, %v350_v32  ;;  %v355_v35 = vsel %vm353_vm12, %v350_v32, %v352_v33 }
  0x91   : > { %503 = vrot.lane.b32.xlu1 %v371_v29, %s833_s29  ;;  %759 = vmatprep.subr.msk.bf16.mxu1 %vm356_vm11, %v355_v35  ;;  %v451_v36 = vsel %vm356_vm11, %v354_v34, 0 }
  0x92   : > { %377 = vrot.lane.b32.xlu0 %v359_v31, %s832_s28 }
  0x93   : > { %459 = vmatpush1.bf16.msra.mxu1 %v451_v36 }
  0x95   : > { %387 = vrot.lane.b32.xlu1 %v352_v33, %s832_s28 }
  0x96   : > { %501 = vrot.lane.b32.xlu0 %v363_v30, %s833_s29  ;;  %760 = vmatmul.mubr.msk.bf16.vlgmr.msra.gmra.mrb[0].mxu1 %vm396_vm13, %v365_v38 }
  0x97   : > { %643 = vmatprep.mubr.bf16.mxu1 %v834_v37 }
  0x99   : > { %383 = vrot.lane.b32.xlu1 %v354_v34, %s832_s28 }
  0x9a   : > { %385 = vrot.lane.b32.xlu0 %v355_v35, %s832_s28 }
  0x9d   : > { %505 = vrot.lane.b32.xlu1 %v354_v34, %s833_s29 }
  0x9e   : > { %499 = vrot.lane.b32.xlu0 %v359_v31, %s833_s29 }
  0xa1   : > { %509 = vrot.lane.b32.xlu1 %v352_v33, %s833_s29 }
  0xa2   : > { %507 = vrot.lane.b32.xlu0 %v355_v35, %s833_s29 }
  0xa5   : > { %588 = vperm.xlu1 %801, %v584_v4  }
  0xa6   : > { %573 = vperm.xlu0 %800, %v570_v39  }
  0xa9   : > { %593 = vperm.xlu1 %801, %v585_v5  }
  0xff   : > { %v382_v40 = vpop.permute.xlu1 %381 }
 0x100   : > { %v380_v41 = vpop.permute.xlu0 %379 }
 0x101   : > { %v391_v42 = vsel %vm389_vm14, %v380_v41, %v382_v40 }
 0x102   : > { %406 = vmatprep.subr.bf16.mxu0 %v391_v42 }
 0x103   : > { %v504_v43 = vpop.permute.xlu1 %503 }
 0x104   : > { %v378_v44 = vpop.permute.xlu0 %377 }
 0x105   : > { %v390_v45 = vsel %vm389_vm14, %v378_v44, %v380_v41 }
 0x106   : > { %407 = vmatpush1.bf16.msra.mxu0 %v390_v45 }
 0x107   : > { %v388_v46 = vpop.permute.xlu1 %387 }
 0x108   : > { %v502_v47 = vpop.permute.xlu0 %501 }
 0x109   : > { %v513_v54 = vsel %vm511_vm15, %v502_v47, %v504_v43 }
 0x10b   : > { %v384_v48 = vpop.permute.xlu1 %383 }
 0x10c   : > { %v386_v49 = vpop.permute.xlu0 %385 }
 0x10d   : > { %v392_v50 = vsel %vm389_vm14, %v384_v48, %v386_v49  ;;  %v393_v51 = vsel %vm389_vm14, %v386_v49, %v388_v46 }
 0x10e   : > { %757 = vmatprep.subr.msk.bf16.mxu0 %vm356_vm11, %v393_v51  ;;  %v401_v52 = vsel %vm356_vm11, %v392_v50, 0 }
 0x10f   : > { %v506_v53 = vpop.permute.xlu1 %505  ;;  %409 = vmatpush1.bf16.msra.mxu0 %v401_v52 }
 0x110   : > { %527 = vmatprep.subr.bf16.mxu0 %v513_v54  ;;  %v500_v56 = vpop.permute.xlu0 %499 }
 0x111   : > { %v512_v57 = vsel %vm511_vm15, %v500_v56, %v502_v47 }
 0x112   : > { %758 = vmatmul.mubr.msk.bf16.vlgmr.msra.gmra.mrb[0].mxu0 %vm396_vm13, %v756_v55 }
 0x113   : > { %v510_v58 = vpop.permute.xlu1 %509  ;;  %528 = vmatpush1.bf16.msra.mxu0 %v512_v57  ;;  %559 = vmatprep.mubr.bf16.mxu0 %v834_v37 }
 0x114   : > { %v508_v59 = vpop.permute.xlu0 %507 }
 0x115   : > { %v514_v60 = vsel %vm511_vm15, %v506_v53, %v508_v59  ;;  %v515_v61 = vsel %vm511_vm15, %v508_v59, %v510_v58 }
 0x116   : > { %v522_v62 = vsel %vm356_vm11, %v514_v60, 0  ;;  %762 = vmatprep.subr.msk.bf16.mxu0 %vm356_vm11, %v515_v61 }
 0x117   : > { %530 = vmatpush1.bf16.msra.mxu0 %v522_v62 }
 0x11a   : > { %763 = vmatmul.mubr.msk.bf16.vlgmr.msra.gmra.mrb[4].mxu0 %vm396_vm13, %v761_v63 }
 0x124   : > { %v589_v27 = vpop.permute.xlu1 %588 }
 0x125   : > { %v574_v13 = vpop.permute.xlu0 %573 }
 0x128   : > { %v594_v33 = vpop.permute.xlu1 %593 }
 0x169   : > { %v490_v0 = vpop.f32.mrb[0].mxu1 }
 0x16a   : > { %v492_v1 = vpop.f32.mrb[1].mxu1 }
 0x16b   : > { %v494_v2 = vpop.f32.mrb[2].mxu1 }
 0x16c   : > { %v495_v3 = vpop.f32.mrb[3].mxu1 }
 0x1e5   : > { %v440_v6 = vpop.f32.mrb[0].mxu0 }
 0x1e6   : > { %v491_v7 = vadd.f32 %v490_v0, %v440_v6  ;;  %v442_v8 = vpop.f32.mrb[1].mxu0 }
 0x1e7   : > { %v493_v9 = vadd.f32 %v492_v1, %v442_v8  ;;  %v444_v10 = vpop.f32.mrb[2].mxu0 }
 0x1e8   : > { %v445_v11 = vpop.f32.mrb[3].mxu0 }
 0x1ed   : > { %v561_v12 = vpop.f32.mrb[4].mxu0 }
 0x1ee   : > { %v568_v14 = vadd.f32 %v561_v12, %v491_v7  ;;  %v563_v15 = vpop.f32.mrb[5].mxu0 }
 0x1ef   : > { %v569_v16 = vadd.f32 %v563_v15, %v493_v9  ;;  %v565_v17 = vpop.f32.mrb[6].mxu0 }
 0x1f0   : > { %v576_v18 = vadd.f32 %v574_v13, %v568_v14  ;;  %v566_v19 = vpop.f32.mrb[7].mxu0 }
 0x1f1   : > { %v577_v20 = vadd.f32 %v574_v13, %v569_v16 }
 0x1f2   : > { %v578_v21 = vmax.f32 %v576_v18, 0.0 }
 0x1f3   : > { %v579_v22 = vmax.f32 %v577_v20, 0.0 }
 0x1f4   : > { %v582_v23 = vpack.c.bf16 %v578_v21, %v578_v21 }
 0x1f5   : > { %v583_v24 = vpack.c.bf16 %v579_v22, %v579_v22 }
 0x1f6   : > { %v606_v25 = vsel %vm356_vm11, %v582_v23, 0 }
 0x1f7   : > { %765 = vmatprep.subr.msk.bf16.mxu1 %vm356_vm11, %v583_v24 }
 0x1f8   : > { %612 = vmatpush1.bf16.msra.mxu1 %v606_v25 }
 0x1fb   : > { %766 = vmatmul.mubr.msk.bf16.vlgmr.msra.gmra.mrb[4].mxu1 %vm601_vm0, %v805_v26 }
 0x2ce   : > { %v645_v28 = vpop.f32.mrb[4].mxu1 }
 0x2cf   : > { %v646_v29 = vadd.f32 %v645_v28, %v589_v27  ;;  %v647_v30 = vpop.f32.mrb[5].mxu1 }
 0x2d0   : > { %v648_v31 = vadd.f32 %v647_v30, %v589_v27  ;;  %v649_v32 = vpop.f32.mrb[6].mxu1 }
 0x2d1   : > { %654 = vst [vmem:[%s246_s26] sm:$0xff] %v646_v29  ;;  %v650_v34 = vadd.f32 %v649_v32, %v594_v33  ;;  %v651_v35 = vpop.f32.mrb[7].mxu1 }
 0x2d2   : > { %655 = vst [vmem:[%s246_s26 + $0x8] sm:$0xff] %v648_v31  ;;  %v652_v36 = vadd.f32 %v651_v35, %v594_v33 }
 0x2d3   : > { %656 = vst [vmem:[%s246_s26 + $0x10] sm:$0x7f] %v650_v34 }
 0x2d4   : > { %657 = vst [vmem:[%s246_s26 + $0x18] sm:$0x7f] %v652_v36 }
 0x2d5 PF: > { %s15_s20 = sadd.s32 1, %s828_s20   ;;  %s955_s18 = smov %s824_s19 }
 0x2d6   : > { %p12_p5 = scmp.ge.s32.totalorder %s15_s20, 4   ;;  %s956_s19 = smov %s958_s21 }
 0x2d8   :  { %14 = sbr.rel (!%p12_p5) target bundleno = 2 (0x2), region = 72 }

</bundles_post_ra>
